<compile_context>
chip_gen: v6e
topology: v6e:2x2x1
jax: 0.10.0
libtpu: 0.0.40
codegen_flags: <defaults>
</compile_context>

<pallas_src>
import functools
import math

import jax
import jax.numpy as jnp
from jax.experimental import pallas as pl
from jax.experimental.pallas import tpu as pltpu


# ------------------------------- kernel -------------------------------------

def _residual_block_kernel(x_ref, w1_ref, w2_ref, b_ref, out_ref, *,
                           img_h, has_projection):
    # x_ref  : (M, W*Cin_p)  f32 activation slab, M = batch_tile * H
    # w1_ref : (3*W*Cin_p, W*Cout_p [+ W*Cout_p]) bf16 conv1 banded weights
    #          (ky stacked along K; projection 1x1 weights fused along N)
    # w2_ref : (3*W*Cout_p, W*Cout_p) bf16 conv2 banded weights
    # b_ref  : (2, W*Cout_p) f32  row0 = BN1 shift, row1 = BN2 (+ BNs) shift
    # out_ref: (M, W*Cout_p) f32, lane-dense (last dim multiple of 128)
    m = x_ref.shape[0]
    wco = out_ref.shape[-1]
    x = x_ref[...]                                          # f32

    # Per-image row index (the batch tile stacks whole images along M).
    rows = jax.lax.broadcasted_iota(jnp.int32, (m, 1), 0)
    if (img_h & (img_h - 1)) == 0:                          # power-of-two H
        h = rows & (img_h - 1)
    else:
        h = rows % img_h
    is_top = h == 0
    is_bot = h == img_h - 1

    def ky_in_k_lhs(a):
        # Build [a(h-1) | a(h) | a(h+1)] along lanes; rows outside the image
        # (SAME padding in H, incl. internal image boundaries) are zeroed.
        up = jnp.where(is_top, 0.0, pltpu.roll(a, shift=1, axis=0))
        dn = jnp.where(is_bot, 0.0, pltpu.roll(a, shift=m - 1, axis=0))
        return jnp.concatenate([up, a, dn], axis=1).astype(jnp.bfloat16)

    # conv1 (+ fused projection shortcut): a single MXU matmul.
    t = jnp.dot(ky_in_k_lhs(x), w1_ref[...], preferred_element_type=jnp.float32)
    y = jnp.maximum(t[:, :wco] + b_ref[0:1, :], 0.0)        # BN1 shift + ReLU
    if has_projection:
        sc = t[:, wco:]                                      # 1x1 conv (BN scale folded)
    else:
        sc = x                                               # identity, exact f32 add

    # conv2: a single MXU matmul; BN2 (+ shortcut BN) shift sits in b_ref[1].
    z = jnp.dot(ky_in_k_lhs(y), w2_ref[...], preferred_element_type=jnp.float32)
    out_ref[...] = jnp.maximum(z + sc + b_ref[1:2, :], 0.0).astype(out_ref.dtype)


# --------------------------- weight preprocessing ----------------------------

def _banded_conv3x3_weights_kmajor(w_hwio, width):
    """w_hwio: (3, 3, Cin, Cout) HWIO weights (BN scale already folded).

    Returns (3*width*Cin, width*Cout): for each row tap ky, a block-banded
    matrix applying the three column taps (kx) of a SAME-padded 3x3 conv to a
    (., width*Cin) slab; the three ky blocks are stacked along K so the conv
    is ONE matmul against [x(h-1) | x(h) | x(h+1)]."""
    _, _, cin, cout = w_hwio.shape
    hp = jax.lax.Precision.HIGHEST
    # sel[kx, w_in, w_out] = 1 iff w_in == w_out + kx - 1 (SAME padding in W)
    sel = jnp.stack([jnp.eye(width, k=1 - kx, dtype=jnp.float32)
                     for kx in range(3)])
    blocks = [jnp.einsum('xpw,xio->piwo', sel, w_hwio[ky], precision=hp)
                 .reshape(width * cin, width * cout)
              for ky in range(3)]
    return jnp.concatenate(blocks, axis=0)


def _shortcut_conv1x1_weights_kmajor(w_io, width):
    """w_io: (Cin, Cout) -> (3*width*Cin, width*Cout): block-diagonal 1x1
    weights placed in the middle (unshifted) K block, zeros elsewhere, so the
    projection shortcut shares conv1's LHS and matmul."""
    cin, cout = w_io.shape
    hp = jax.lax.Precision.HIGHEST
    blk = jnp.einsum('pw,io->piwo', jnp.eye(width, dtype=jnp.float32), w_io,
                     precision=hp).reshape(width * cin, width * cout)
    zeros = jnp.zeros_like(blk)
    return jnp.concatenate([zeros, blk, zeros], axis=0)


# -------------------------------- wrapper ------------------------------------

def _pick_batch_tile(n, h, target_m=512):
    """Largest divisor of n whose (batch_tile*h, .) block keeps M <= target_m
    and satisfies the (8, 128) sublane constraint."""
    cands = [d for d in range(1, n + 1) if n % d == 0 and (d * h) % 8 == 0]
    if not cands:
        return n                      # full-array block (no sublane constraint)
    fitting = [d for d in cands if d * h <= target_m]
    return max(fitting) if fitting else min(cands)


def residual_block(x_nchw, params, *, has_projection=True, batch_tile=None):
    """x_nchw: (N, Cin, H, W) float32 (PyTorch layout). Returns (N, Cout, H, W)."""
    w1, s1, b1, w2, s2, b2, ws, ss, bs = params
    N, Cin, H, W = x_nchw.shape
    Cout = w1.shape[-1]
    if not has_projection and Cin != Cout:
        raise ValueError("identity shortcut requires in_channel == out_channel")

    # Pad channels so W*C is a multiple of 128 (lane-aligned K blocks, full
    # 128-wide output stores, better MXU K depth on v5e).
    step = 128 // math.gcd(W, 128)
    cin_p = -(-Cin // step) * step
    cout_p = -(-Cout // step) * step

    def pad_io(w, ci, co):
        pad = [(0, 0)] * (w.ndim - 2) + [(0, ci - w.shape[-2]),
                                         (0, co - w.shape[-1])]
        return jnp.pad(w, pad)

    # One-time weight transform: fold BN scale, pad channels, build banded
    # (ky-in-K) matrices, fuse the projection shortcut along N.
    w1f = pad_io(w1 * s1.reshape(1, 1, 1, Cout), cin_p, cout_p)
    w2f = pad_io(w2 * s2.reshape(1, 1, 1, Cout), cout_p, cout_p)
    w1op = _banded_conv3x3_weights_kmajor(w1f, W)
    if has_projection:
        wsf = pad_io(ws * ss.reshape(1, Cout), cin_p, cout_p)
        w1op = jnp.concatenate(
            [w1op, _shortcut_conv1x1_weights_kmajor(wsf, W)], axis=1)
    w1op = w1op.astype(jnp.bfloat16)
    w2op = _banded_conv3x3_weights_kmajor(w2f, W).astype(jnp.bfloat16)

    def pad_bias(v):
        return jnp.pad(v.reshape(-1), (0, cout_p - Cout))
    b1row = jnp.tile(pad_bias(b1), W)
    b2row = jnp.tile(pad_bias(b2) + (pad_bias(bs) if has_projection else 0.0), W)
    biases = jnp.stack([b1row, b2row]).astype(jnp.float32)    # (2, W*cout_p)

    # NCHW -> lane-dense f32 slab with whole images stacked along rows.
    # (f32 so the identity residual add is exact; bf16 cast happens in-kernel,
    #  only for the MXU operands.)
    x = jnp.transpose(x_nchw, (0, 2, 3, 1))                   # NHWC
    x = jnp.pad(x, ((0, 0), (0, 0), (0, 0), (0, cin_p - Cin)))
    x_slab = x.reshape(N * H, W * cin_p).astype(jnp.float32)

    bt = batch_tile if batch_tile is not None else _pick_batch_tile(N, H)
    if N % bt != 0 or ((bt * H) % 8 != 0 and bt != N):
        raise ValueError(f"batch_tile={bt} incompatible with N={N}, H={H}")
    # TODO(synk): on v7x prefer a batch_tile keeping N//bt >= 2 (and even) so
    #             both TensorCores get work; with tiny N, fat M wins instead.

    kernel = functools.partial(_residual_block_kernel, img_h=H,
                               has_projection=has_projection)

    out_slab = pl.pallas_call(
        kernel,
        out_shape=jax.ShapeDtypeStruct((N * H, W * cout_p), jnp.float32),
        grid_spec=pltpu.PrefetchScalarGridSpec(
            num_scalar_prefetch=0,
            grid=(N // bt,),                     # batch_tile images per step
            in_specs=[
                pl.BlockSpec((bt * H, W * cin_p), lambda n: (n, 0)),
                pl.BlockSpec(w1op.shape, lambda n: (0, 0)),
                pl.BlockSpec(w2op.shape, lambda n: (0, 0)),
                pl.BlockSpec(biases.shape, lambda n: (0, 0)),
            ],
            out_specs=pl.BlockSpec((bt * H, W * cout_p), lambda n: (n, 0)),
        ),
        compiler_params=pltpu.CompilerParams(
            dimension_semantics=("parallel",)),   # batch sharding on v7x
    )(x_slab, w1op, w2op, biases)

    out = out_slab.reshape(N, H, W, cout_p)[..., :Cout]
    # TODO(synk): for chained layers, keep the lane-dense NHWC slab (and bf16)
    #             instead of converting back to NCHW f32 at every block.
    return jnp.transpose(out, (0, 3, 1, 2))                   # -> NCHW


# --------------------------- helpers / reference -----------------------------

def fold_bn(gamma, beta, mean, var, eps=1e-5):
    scale = gamma / jnp.sqrt(var + eps)
    shift = beta - mean * scale
    return scale.reshape(1, -1), shift.reshape(1, -1)


def _reference(x_nchw, params, *, has_projection, quantize_like_kernel=False):
    """Pure-JAX reference. With quantize_like_kernel=True, MXU operands are
    rounded to bf16 exactly like the kernel (only accumulation order differs)."""
    w1, s1, b1, w2, s2, b2, ws, ss, bs = params
    Cout = w1.shape[-1]
    hp = jax.lax.Precision.HIGHEST
    dn = ('NHWC', 'HWIO', 'NHWC')
    q = ((lambda a: a.astype(jnp.bfloat16).astype(jnp.float32))
         if quantize_like_kernel else (lambda a: a))

    x = jnp.transpose(x_nchw, (0, 2, 3, 1))
    w1f = q(w1 * s1.reshape(1, 1, 1, Cout))
    w2f = q(w2 * s2.reshape(1, 1, 1, Cout))

    y = jax.lax.conv_general_dilated(q(x), w1f, (1, 1), 'SAME',
                                     dimension_numbers=dn, precision=hp)
    y = jnp.maximum(y + b1[0], 0.0)
    y = jax.lax.conv_general_dilated(q(y), w2f, (1, 1), 'SAME',
                                     dimension_numbers=dn, precision=hp) + b2[0]
    if has_projection:
        wsf = q(ws * ss.reshape(1, Cout))
        sc = jax.lax.conv_general_dilated(q(x), wsf.reshape(1, 1, *ws.shape),
                                          (1, 1), 'SAME', dimension_numbers=dn,
                                          precision=hp) + bs[0]
    else:
        sc = x                                   # identity adds the f32 input
    out = jnp.maximum(y + sc, 0.0)
    return jnp.transpose(out, (0, 3, 1, 2))


if __name__ == "__main__":
    key = jax.random.PRNGKey(0)

    def bn_params(c, base):
        gamma = 1.0 + 0.05 * jnp.arange(c, dtype=jnp.float32)
        beta = base + 0.01 * jnp.arange(c, dtype=jnp.float32)
        mean = 0.02 * jnp.arange(c, dtype=jnp.float32)
        var = 1.0 + 0.03 * jnp.arange(c, dtype=jnp.float32)
        return gamma, beta, mean, var

    def run_case(case_key, N, Cin, Cout, H, W, has_projection):
        ks = jax.random.split(case_key, 4)
        x = jax.random.normal(ks[0], (N, Cin, H, W), jnp.float32)
        w1 = 0.1 * jax.random.normal(ks[1], (3, 3, Cin, Cout), jnp.float32)
        w2 = 0.1 * jax.random.normal(ks[2], (3, 3, Cout, Cout), jnp.float32)
        ws = 0.1 * jax.random.normal(ks[3], (Cin, Cout), jnp.float32)
        s1, b1 = fold_bn(*bn_params(Cout, 0.0))
        s2, b2 = fold_bn(*bn_params(Cout, 0.1))
        ss, bs = fold_bn(*bn_params(Cout, -0.1))
        params = (w1, s1, b1, w2, s2, b2, ws, ss, bs)

        out = jax.block_until_ready(
            residual_block(x, params, has_projection=has_projection))
        assert out.shape == (N, Cout, H, W)

        # Tight check vs. a reference using the same bf16-rounded MXU operands
        # (only f32 accumulation order differs).
        ref_q = _reference(x, params, has_projection=has_projection,
                           quantize_like_kernel=True)
        err_q = float(jnp.max(jnp.abs(out - ref_q)))
        assert jnp.allclose(out, ref_q, atol=1e-2, rtol=1e-2), \
            f"max abs err vs bf16-quantized ref = {err_q}"

        # Looser sanity check vs. pure-f32 module semantics (accuracy bounded
        # by the bf16 MXU operands).
        ref_f = _reference(x, params, has_projection=has_projection,
                           quantize_like_kernel=False)
        err_f = float(jnp.max(jnp.abs(out - ref_f)))
        assert jnp.allclose(out, ref_f, atol=1e-1, rtol=1e-1), \
            f"max abs err vs f32 ref = {err_f}"

    k0, k1 = jax.random.split(key)
    # ResidualBlock(in=4, out=8, stride=1): channels differ -> projection shortcut.
    run_case(k0, N=2, Cin=4, Cout=8, H=16, W=16, has_projection=True)
    # ResidualBlock(in=8, out=8, stride=1): identity shortcut (exact f32 residual add).
    run_case(k1, N=2, Cin=8, Cout=8, H=16, W=16, has_projection=False)

    print("KERNEL_OK")
</pallas_src>

<mosaic_0001>
module attributes {stable_mosaic.version = 11 : i64} {
  func.func @_residual_block_kernel(%arg0: i32, %arg1: memref<32x128xf32, #tpu.memory_space<vmem>>, %arg2: memref<384x256xbf16, #tpu.memory_space<vmem>>, %arg3: memref<384x128xbf16, #tpu.memory_space<vmem>>, %arg4: memref<2x128xf32, #tpu.memory_space<vmem>>, %arg5: memref<32x128xf32, #tpu.memory_space<vmem>>) attributes {dimension_semantics = [#tpu.dimension_semantics<parallel>], iteration_bounds = array<i64: 1>, scalar_prefetch = 0 : i64, scratch_operands = 0 : i64, tpu.core_type = #tpu.core_type<tc>, window_params = [{transform_indices = @transform_0, window_bounds = array<i64: 32, 128>}, {pipeline_mode = #tpu.pipeline_mode<synchronous>, transform_indices = @transform_1, window_bounds = array<i64: 384, 256>}, {pipeline_mode = #tpu.pipeline_mode<synchronous>, transform_indices = @transform_2, window_bounds = array<i64: 384, 128>}, {pipeline_mode = #tpu.pipeline_mode<synchronous>, transform_indices = @transform_3, window_bounds = array<i64: 2, 128>}, {transform_indices = @transform_4, window_bounds = array<i64: 32, 128>}]} {
    %c0 = arith.constant 0 : index
    %c0_0 = arith.constant 0 : index
    %0 = vector.load %arg1[%c0, %c0_0] : memref<32x128xf32, #tpu.memory_space<vmem>>, vector<32x128xf32>
    %1 = tpu.iota {dimensions = array<i32: 0>} : vector<32x1xi32>
    %c15_i32 = arith.constant 15 : i32
    %2 = vector.broadcast %c15_i32 : i32 to vector<32x1xi32>
    %3 = arith.andi %1, %2 : vector<32x1xi32>
    %c0_i32 = arith.constant 0 : i32
    %4 = vector.broadcast %c0_i32 : i32 to vector<32x1xi32>
    %5 = arith.cmpi eq, %3, %4 : vector<32x1xi32>
    %c15_i32_1 = arith.constant 15 : i32
    %6 = vector.broadcast %c15_i32_1 : i32 to vector<32x1xi32>
    %7 = arith.cmpi eq, %3, %6 : vector<32x1xi32>
    %c1_i32 = arith.constant 1 : i32
    %8 = tpu.dynamic_rotate %0 by %c1_i32 dim 0 : vector<32x128xf32>, i32 -> vector<32x128xf32>
    %cst = arith.constant 0.000000e+00 : f32
    %9 = vector.shape_cast %5 : vector<32x1xi1> to vector<32x1xi1>
    %10 = vector.broadcast %9 : vector<32x1xi1> to vector<32x128xi1>
    %11 = vector.broadcast %cst : f32 to vector<32x128xf32>
    %12 = arith.select %10, %11, %8 : vector<32x128xi1>, vector<32x128xf32>
    %c31_i32 = arith.constant 31 : i32
    %13 = tpu.dynamic_rotate %0 by %c31_i32 dim 0 : vector<32x128xf32>, i32 -> vector<32x128xf32>
    %cst_2 = arith.constant 0.000000e+00 : f32
    %14 = vector.shape_cast %7 : vector<32x1xi1> to vector<32x1xi1>
    %15 = vector.broadcast %14 : vector<32x1xi1> to vector<32x128xi1>
    %16 = vector.broadcast %cst_2 : f32 to vector<32x128xf32>
    %17 = arith.select %15, %16, %13 : vector<32x128xi1>, vector<32x128xf32>
    %18 = tpu.concatenate %12, %0, %17 in 1 : vector<32x128xf32>, vector<32x128xf32>, vector<32x128xf32> -> vector<32x384xf32>
    %19 = arith.truncf %18 : vector<32x384xf32> to vector<32x384xbf16>
    %c0_3 = arith.constant 0 : index
    %c0_4 = arith.constant 0 : index
    %20 = vector.load %arg2[%c0_3, %c0_4] : memref<384x256xbf16, #tpu.memory_space<vmem>>, vector<384x256xbf16>
    %cst_5 = arith.constant dense<0.000000e+00> : vector<32x256xf32>
    %21 = tpu.matmul %19, %20, %cst_5 {dimension_numbers = #tpu.dot_dimension_numbers<[1], [0], [0], [1], [0, 0, 1, 1], [], []>} : vector<32x384xbf16>, vector<384x256xbf16>, vector<32x256xf32> -> vector<32x256xf32>
    %22 = vector.extract_strided_slice %21 {offsets = [0, 0], sizes = [32, 128], strides = [1, 1]} : vector<32x256xf32> to vector<32x128xf32>
    %c0_6 = arith.constant 0 : index
    %c0_7 = arith.constant 0 : index
    %23 = vector.load %arg4[%c0_6, %c0_7] : memref<2x128xf32, #tpu.memory_space<vmem>>, vector<1x128xf32>
    %24 = vector.broadcast %23 : vector<1x128xf32> to vector<32x128xf32>
    %25 = arith.addf %22, %24 : vector<32x128xf32>
    %cst_8 = arith.constant 0.000000e+00 : f32
    %26 = vector.broadcast %cst_8 : f32 to vector<32x128xf32>
    %27 = arith.maximumf %25, %26 : vector<32x128xf32>
    %28 = vector.extract_strided_slice %21 {offsets = [0, 128], sizes = [32, 128], strides = [1, 1]} : vector<32x256xf32> to vector<32x128xf32>
    %c1_i32_9 = arith.constant 1 : i32
    %29 = tpu.dynamic_rotate %27 by %c1_i32_9 dim 0 : vector<32x128xf32>, i32 -> vector<32x128xf32>
    %cst_10 = arith.constant 0.000000e+00 : f32
    %30 = vector.shape_cast %5 : vector<32x1xi1> to vector<32x1xi1>
    %31 = vector.broadcast %30 : vector<32x1xi1> to vector<32x128xi1>
    %32 = vector.broadcast %cst_10 : f32 to vector<32x128xf32>
    %33 = arith.select %31, %32, %29 : vector<32x128xi1>, vector<32x128xf32>
    %c31_i32_11 = arith.constant 31 : i32
    %34 = tpu.dynamic_rotate %27 by %c31_i32_11 dim 0 : vector<32x128xf32>, i32 -> vector<32x128xf32>
    %cst_12 = arith.constant 0.000000e+00 : f32
    %35 = vector.shape_cast %7 : vector<32x1xi1> to vector<32x1xi1>
    %36 = vector.broadcast %35 : vector<32x1xi1> to vector<32x128xi1>
    %37 = vector.broadcast %cst_12 : f32 to vector<32x128xf32>
    %38 = arith.select %36, %37, %34 : vector<32x128xi1>, vector<32x128xf32>
    %39 = tpu.concatenate %33, %27, %38 in 1 : vector<32x128xf32>, vector<32x128xf32>, vector<32x128xf32> -> vector<32x384xf32>
    %40 = arith.truncf %39 : vector<32x384xf32> to vector<32x384xbf16>
    %c0_13 = arith.constant 0 : index
    %c0_14 = arith.constant 0 : index
    %41 = vector.load %arg3[%c0_13, %c0_14] : memref<384x128xbf16, #tpu.memory_space<vmem>>, vector<384x128xbf16>
    %cst_15 = arith.constant dense<0.000000e+00> : vector<32x128xf32>
    %42 = tpu.matmul %40, %41, %cst_15 {dimension_numbers = #tpu.dot_dimension_numbers<[1], [0], [0], [1], [0, 0, 1, 1], [], []>} : vector<32x384xbf16>, vector<384x128xbf16>, vector<32x128xf32> -> vector<32x128xf32>
    %43 = arith.addf %42, %28 : vector<32x128xf32>
    %c1 = arith.constant 1 : index
    %c0_16 = arith.constant 0 : index
    %44 = vector.load %arg4[%c1, %c0_16] : memref<2x128xf32, #tpu.memory_space<vmem>>, vector<1x128xf32>
    %45 = vector.broadcast %44 : vector<1x128xf32> to vector<32x128xf32>
    %46 = arith.addf %43, %45 : vector<32x128xf32>
    %cst_17 = arith.constant 0.000000e+00 : f32
    %47 = vector.broadcast %cst_17 : f32 to vector<32x128xf32>
    %48 = arith.maximumf %46, %47 : vector<32x128xf32>
    %c0_18 = arith.constant 0 : index
    %c0_19 = arith.constant 0 : index
    %49 = vector.load %arg5[%c0_18, %c0_19] : memref<32x128xf32, #tpu.memory_space<vmem>>, vector<32x128xf32>
    tpu.vector_store %arg5[%c0_18, %c0_19], %48 {strides = array<i32>} : memref<32x128xf32, #tpu.memory_space<vmem>>, vector<32x128xf32>,
    return
  }
  func.func @transform_0(%arg0: i32) -> (i32, i32) {
    %c0_i32 = arith.constant 0 : i32
    %c0_i32_0 = arith.constant 0 : i32
    return %arg0, %c0_i32 : i32, i32
  }
  func.func @transform_1(%arg0: i32) -> (i32, i32) {
    %c0_i32 = arith.constant 0 : i32
    %c0_i32_0 = arith.constant 0 : i32
    %c0_i32_1 = arith.constant 0 : i32
    return %c0_i32, %c0_i32_0 : i32, i32
  }
  func.func @transform_2(%arg0: i32) -> (i32, i32) {
    %c0_i32 = arith.constant 0 : i32
    %c0_i32_0 = arith.constant 0 : i32
    %c0_i32_1 = arith.constant 0 : i32
    return %c0_i32, %c0_i32_0 : i32, i32
  }
  func.func @transform_3(%arg0: i32) -> (i32, i32) {
    %c0_i32 = arith.constant 0 : i32
    %c0_i32_0 = arith.constant 0 : i32
    %c0_i32_1 = arith.constant 0 : i32
    return %c0_i32, %c0_i32_0 : i32, i32
  }
  func.func @transform_4(%arg0: i32) -> (i32, i32) {
    %c0_i32 = arith.constant 0 : i32
    %c0_i32_0 = arith.constant 0 : i32
    return %arg0, %c0_i32 : i32, i32
  }
}

</mosaic_0001>

<bundles_post_ra>
// kernel: tpu_custom_call.1
= control target key start
LH: loop header
LB: loop body
LE: loop exit
PB: predicated region body
PF: predicated region fallthrough
CT: control target
= control target key end

     0   :  { %9 = vsyncpa [#allocation3], 0  ;;  %s1423_s0 = inlined_call_operand.hbm [shape: f32[32,128], index: 0, kind: input, shape index: {}]   ;;  %s1424_s1 = inlined_call_operand.hbm [shape: bf16[384,256], index: 1, kind: input, shape index: {}]   ;;  %s1425_s2 = inlined_call_operand.hbm [shape: bf16[384,128], index: 2, kind: input, shape index: {}]   ;;  %s1426_s3 = inlined_call_operand.vmem [shape: f32[2,128], index: 3, kind: input, shape index: {}]   ;;  %s1427_s4 = inlined_call_operand.hbm [shape: f32[32,128], index: 4, kind: output, shape index: {}]  }
   0x1   :  { %10 = vsyncpa [#allocation6], 0 }
   0x2   :  { %11 = vsyncpa [#allocation4], 0  ;;  %s1251_s15 = smov [#allocation5]   ;;  %s1252_s17 = smov [#allocation2]  }
   0x3   :  { %s29_s16 = sshll.u32 %s1251_s15, 4  ;;  %s17_s18 = sshll.u32 %s1252_s17, 4  ;;  %s30_s16 = int_to_ptr.vmem [resolvable:$true] %s29_s16  ;;  %s18_s18 = int_to_ptr.vmem [resolvable:$true] %s17_s18 }
   0x4   :  { %s1173_s19 = scalar_lea.vmem %s30_s16, 6144  ;;  %p1178_p1 = scmp.lt.s32.totalorder %s30_s16, %s30_s16 }
   0x5   :  { %p1174_p0 = scmp.ne.s32.totalorder %s30_s16, %s1173_s19  ;;  %p1179_p2 = scmp.lt.s32.totalorder %s1173_s19, %s1173_s19 }
   0x7   :  { %p1180_p3 = por %p1179_p2, %p1178_p1 }
   0x9   :  { %p1181_p4 = pnand %p1180_p3, %p1174_p0 }
   0xb   :  { %1184 = shalt.err (!%p1181_p4)
}
   0xc   :  { %s1253_s20 = smov 128   ;;  %s1254_s21 = smov 8  }
   0xd   :  { %35 = dma.hbm_to_vmem [thread:$0]  %s1424_s1, 6144, %s30_s16, [#allocation6], %s1253_s20, %s1253_s20, %s1254_s21  }
   0xe   :  { %s1193_s24 = scalar_lea.vmem %s18_s18, 512  ;;  %p1198_p6 = scmp.lt.s32.totalorder %s18_s18, %s18_s18 }
   0xf   :  { %p1194_p5 = scmp.ne.s32.totalorder %s18_s18, %s1193_s24  ;;  %p1199_p7 = scmp.lt.s32.totalorder %s1193_s24, %s1193_s24 }
  0x11   :  { %p1200_p8 = por %p1199_p7, %p1198_p6 }
  0x13   :  { %p1201_p9 = pnand %p1200_p8, %p1194_p5 }
  0x15   :  { %1204 = shalt.err (!%p1201_p9)
}
  0x16   :  { %23 = dma.hbm_to_vmem [thread:$0]  %s1423_s0, 512, %s18_s18, [#allocation3], %s1253_s20, %s1253_s20, %s1254_s21  }
  0x17   :  { %s1255_s27 = smov [#allocation7]  }
  0x18   :  { %s41_s28 = sshll.u32 %s1255_s27, 4  ;;  %s42_s28 = int_to_ptr.vmem [resolvable:$true] %s41_s28 }
  0x19   :  { %s1213_s29 = scalar_lea.vmem %s42_s28, 3072  ;;  %p1218_p11 = scmp.lt.s32.totalorder %s42_s28, %s42_s28 }
  0x1a   :  { %p1214_p10 = scmp.ne.s32.totalorder %s42_s28, %s1213_s29  ;;  %p1219_p12 = scmp.lt.s32.totalorder %s1213_s29, %s1213_s29 }
  0x1c   :  { %p1220_p13 = por %p1219_p12, %p1218_p11 }
  0x1e   :  { %p1221_p0 = pnand %p1220_p13, %p1214_p10 }
  0x20   :  { %1224 = shalt.err (!%p1221_p0)
}
  0x21   :  { %s1256_s1 = smov 64   ;;  %s1257_s30 = smov 4  }
  0x22   :  { %47 = dma.hbm_to_vmem [thread:$0]  %s1425_s2, 3072, %s42_s28, [#allocation6], %s1256_s1, %s1256_s1, %s1257_s30  }
  0x23   :  { %1245 = dma.done.wait [#allocation3], 512  }
  0x24   :  { %1246 = vsyncadd [#allocation3], 4294966784 }
  0x25   :  { %1247 = dma.done.wait [#allocation6], 9216  }
  0x26   :  { %1248 = vsyncadd [#allocation6], 4294958080  ;;  %v1258_v0 = vmov 0   ;;  %v1069_v1 = vld [vmem:[#allocation5 + $0x74] ss:$8 sps:$4 sm:$0xff]   ;;  %v64_v17 = vlaneseq  ;;  %v1306_v36 = vld [vmem:[#allocation2] sm:$0xff] }
  0x27   :  { %502 = vmatprep.mubr.bf16.mxu1 %v1258_v0  ;;  %v1071_v2 = vld [vmem:[#allocation5 + $0x70] ss:$8 sps:$4 sm:$0xff]   ;;  %417 = vmatprep.subr.bf16.mxu0 %v1069_v1  ;;  %v1072_v3 = vld [vmem:[#allocation5 + $0x64] ss:$8 sps:$4 sm:$0xff]   ;;  %v1074_v4 = vld [vmem:[#allocation5 + $0x60] ss:$8 sps:$4 sm:$0xff]  }
  0x28   :  { %418 = vmatpush1.bf16.msra.mxu0 %v1071_v2  ;;  %v1075_v5 = vld [vmem:[#allocation5 + $0x54] ss:$8 sps:$4 sm:$0xff]   ;;  %v1077_v6 = vld [vmem:[#allocation5 + $0x50] ss:$8 sps:$4 sm:$0xff]   ;;  %v1078_v7 = vld [vmem:[#allocation5 + $0x44] ss:$8 sps:$4 sm:$0xff]  }
  0x29   :  { %419 = vmatprep.subr.bf16.mxu0 %v1072_v3  ;;  %v1090_v8 = vld [vmem:[#allocation5 + $0x174] ss:$8 sps:$4 sm:$0xff]   ;;  %v1092_v9 = vld [vmem:[#allocation5 + $0x170] ss:$8 sps:$4 sm:$0xff]   ;;  %v1080_v10 = vld [vmem:[#allocation5 + $0x40] ss:$8 sps:$4 sm:$0xff]  }
  0x2a   :  { %v1081_v11 = vld [vmem:[#allocation5 + $0x34] ss:$8 sps:$4 sm:$0xff]   ;;  %470 = vmatprep.subr.bf16.mxu1 %v1090_v8  ;;  %v1096_v12 = vld [vmem:[#allocation5 + $0x164] ss:$8 sps:$4 sm:$0xff]   ;;  %v1098_v13 = vld [vmem:[#allocation5 + $0x160] ss:$8 sps:$4 sm:$0xff]  }
  0x2b   :  { %471 = vmatpush1.bf16.msra.mxu1 %v1092_v9  ;;  %v1083_v14 = vld [vmem:[#allocation5 + $0x30] ss:$8 sps:$4 sm:$0xff]   ;;  %v1102_v15 = vld [vmem:[#allocation5 + $0x154] ss:$8 sps:$4 sm:$0xff]   ;;  %v1084_v16 = vld [vmem:[#allocation5 + $0x24] ss:$8 sps:$4 sm:$0xff]  }
  0x2c   :  { %420 = vmatpush1.bf16.msra.mxu0 %v1074_v4  ;;  %472 = vmatprep.subr.bf16.mxu1 %v1096_v12  ;;  %v1104_v18 = vld [vmem:[#allocation5 + $0x150] ss:$8 sps:$4 sm:$0xff]   ;;  %v1108_v19 = vld [vmem:[#allocation5 + $0x144] ss:$8 sps:$4 sm:$0xff]   ;;  %v1086_v20 = vld [vmem:[#allocation5 + $0x20] ss:$8 sps:$4 sm:$0xff]  }
  0x2d   :  { %421 = vmatprep.subr.bf16.mxu0 %v1075_v5  ;;  %v1087_v21 = vld [vmem:[#allocation5 + $0x14] ss:$8 sps:$4 sm:$0xff]   ;;  %v1302_v22 = vshrl.u32 %v64_v17, 7  ;;  %v1110_v23 = vld [vmem:[#allocation5 + $0x140] ss:$8 sps:$4 sm:$0xff]   ;;  %v102_v46 = vrot.slane %v1306_v36, 1 }
  0x2e   :  { %v1114_v24 = vld [vmem:[#allocation5 + $0x134] ss:$8 sps:$4 sm:$0xff]   ;;  %v1089_v25 = vld [vmem:[#allocation5 + $0x10] ss:$8 sps:$4 sm:$0xff]   ;;  %v1093_v26 = vld [vmem:[#allocation5 + $0x4] ss:$8 sps:$4 sm:$0xff]  }
  0x2f   :  { %473 = vmatpush1.bf16.msra.mxu1 %v1098_v13  ;;  %v66_v27 = vadd.s32 8, %v1302_v22  ;;  %v1116_v28 = vld [vmem:[#allocation5 + $0x130] ss:$8 sps:$4 sm:$0xff]   ;;  %v1120_v29 = vld [vmem:[#allocation5 + $0x124] ss:$8 sps:$4 sm:$0xff]   ;;  %v68_v33 = vadd.s32 24, %v1302_v22 }
  0x30   :  { %422 = vmatpush1.bf16.msra.mxu0 %v1077_v6  ;;  %474 = vmatprep.subr.bf16.mxu1 %v1102_v15  ;;  %v1095_v30 = vld [vmem:[#allocation5] ss:$8 sps:$4 sm:$0xff]   ;;  %v1099_v31 = vld [vmem:[#allocation5 + $0xf4] ss:$8 sps:$4 sm:$0xff]   ;;  %v1101_v37 = vld [vmem:[#allocation5 + $0xf0] ss:$8 sps:$4 sm:$0xff]  }
  0x31   :  { %423 = vmatprep.subr.bf16.mxu0 %v1078_v7  ;;  %v70_v32 = vand.u32 15, %v66_v27  ;;  %v1122_v34 = vld [vmem:[#allocation5 + $0x120] ss:$8 sps:$4 sm:$0xff]   ;;  %v1126_v35 = vld [vmem:[#allocation5 + $0x114] ss:$8 sps:$4 sm:$0xff]   ;;  %v72_v43 = vand.u32 15, %v68_v33 }
  0x32   :  { %v1308_v38 = vld [vmem:[#allocation2 + $0x8] sm:$0xff]  ;;  %v1310_v39 = vld [vmem:[#allocation2 + $0x10] sm:$0xff]  ;;  %vm106_vm1 = vcmp.lt.s32.totalorder %v1302_v22, 7  ;;  %vm1259_vm2 = vmmov 1   ;;  %v1329_v53 = vld [vmem:[#allocation2 + $0x18] sm:$0xff]  ;;  %vm85_vm6 = vcmp.lt.s32.totalorder %v1302_v22, 1 }
  0x33   :  { %475 = vmatpush1.bf16.msra.mxu1 %v1104_v18  ;;  %v1105_v40 = vld [vmem:[#allocation5 + $0xe4] ss:$8 sps:$4 sm:$0xff]   ;;  %vm1312_vm0 = vcmp.ne.s32.totalorder %v70_v32, 15  ;;  %v124_v42 = vpack.c.bf16 %v1308_v38, %v1306_v36  ;;  %v1107_v44 = vld [vmem:[#allocation5 + $0xe0] ss:$8 sps:$4 sm:$0xff]   ;;  %v103_v47 = vrot.slane %v1308_v38, 1 }
  0x34   :  { %424 = vmatpush1.bf16.msra.mxu0 %v1080_v10  ;;  %476 = vmatprep.subr.bf16.mxu1 %v1108_v19  ;;  %v1128_v45 = vld [vmem:[#allocation5 + $0x110] ss:$8 sps:$4 sm:$0xff]   ;;  %v104_v48 = vrot.slane %v1310_v39, 1  ;;  %v1111_v49 = vld [vmem:[#allocation5 + $0xd4] ss:$8 sps:$4 sm:$0xff]   ;;  %vm1325_vm3 = vmpackc.low %vm1312_vm0, %vm1259_vm2  ;;  %vm1331_vm4 = vcmp.ne.s32.totalorder %v72_v43, 15 }
  0x35   :  { %425 = vmatprep.subr.bf16.mxu0 %v1081_v11  ;;  %v1132_v50 = vld [vmem:[#allocation5 + $0x104] ss:$8 sps:$4 sm:$0xff]   ;;  %449 = vmatprep.mubr.bf16.mxu0 %v124_v42  ;;  %v1134_v51 = vld [vmem:[#allocation5 + $0x100] ss:$8 sps:$4 sm:$0xff]   ;;  %v1113_v55 = vld [vmem:[#allocation5 + $0xd0] ss:$8 sps:$4 sm:$0xff]   ;;  %v109_v57 = vsel %vm106_vm1, %v102_v46, %v103_v47 }
  0x36   :  { %v108_v56 = vsel %vm106_vm1, %v103_v47, %v104_v48  ;;  %v105_v58 = vrot.slane %v1329_v53, 1  ;;  %v1141_v59 = vld [vmem:[#allocation7 + $0x78] sm:$0xff]   ;;  %v1117_v60 = vld [vmem:[#allocation5 + $0xc4] ss:$8 sps:$4 sm:$0xff]   ;;  %v1119_v63 = vld [vmem:[#allocation5 + $0xc0] ss:$8 sps:$4 sm:$0xff]  }
  0x37   :  { %477 = vmatpush1.bf16.msra.mxu1 %v1110_v23  ;;  %v1143_v61 = vld [vmem:[#allocation7 + $0x38] sm:$0xff]   ;;  %v949_v62 = vpack.c.bf16 %v108_v56, %v109_v57  ;;  %vm1343_vm5 = vmpackc.low %vm1331_vm4, %vm1259_vm2  ;;  %v1129_v6 = vld [vmem:[#allocation5 + $0xa4] ss:$8 sps:$4 sm:$0xff]   ;;  %v81_v10 = vrot.slane %v1306_v36, 7  ;;  %v82_v11 = vrot.slane %v1308_v38, 7  ;;  %v84_v12 = vrot.slane %v1329_v53, 7 }
  0x38   :  { %426 = vmatpush1.bf16.msra.mxu0 %v1083_v14  ;;  %478 = vmatprep.subr.bf16.mxu1 %v1114_v24  ;;  %v1123_v2 = vld [vmem:[#allocation5 + $0xb4] ss:$8 sps:$4 sm:$0xff]   ;;  %v1125_v3 = vld [vmem:[#allocation5 + $0xb0] ss:$8 sps:$4 sm:$0xff]   ;;  %v107_v4 = vsel %vm106_vm1, %v104_v48, %v105_v58  ;;  %v110_v5 = vsel %vm106_vm1, %v105_v58, %v102_v46  ;;  %v1131_v8 = vld [vmem:[#allocation5 + $0xa0] ss:$8 sps:$4 sm:$0xff]   ;;  %v127_v23 = vpack.c.bf16 %v1329_v53, %v1310_v39 }
  0x39   :  { %427 = vmatprep.subr.bf16.mxu0 %v1084_v16  ;;  %v953_v7 = vpack.c.bf16 %v110_v5, %v107_v4  ;;  %v1135_v9 = vld [vmem:[#allocation5 + $0x94] ss:$8 sps:$4 sm:$0xff]   ;;  %v1138_v13 = vld [vmem:[#allocation5 + $0x84] ss:$8 sps:$4 sm:$0xff]   ;;  %v69_v14 = vand.u32 15, %v1302_v22  ;;  %v88_v16 = vsel %vm85_vm6, %v81_v10, %v82_v11  ;;  %v89_v17 = vsel %vm85_vm6, %v84_v12, %v81_v10 }
  0x3a   :  { %v1140_v15 = vld [vmem:[#allocation5 + $0x80] ss:$8 sps:$4 sm:$0xff]   ;;  %v67_v18 = vadd.s32 16, %v1302_v22  ;;  %v1142_v19 = vld [vmem:[#allocation7 + $0xb8] sm:$0xff]   ;;  %v83_v24 = vrot.slane %v1310_v39, 7  ;;  %v1146_v32 = vld [vmem:[#allocation7 + $0x30] sm:$0xff]  }
  0x3b   :  { %479 = vmatpush1.bf16.msra.mxu1 %v1116_v28  ;;  %vm997_vm7 = vcmp.ne.s32.totalorder %v69_v14, 0  ;;  %v1147_v33 = vld [vmem:[#allocation7 + $0x68] sm:$0xff]   ;;  %v1150_v36 = vld [vmem:[#allocation7 + $0x60] sm:$0xff]   ;;  %v1153_v39 = vld [vmem:[#allocation7 + $0x58] sm:$0xff]  }
  0x3c   :  { %428 = vmatpush1.bf16.msra.mxu0 %v1086_v20  ;;  %480 = vmatprep.subr.bf16.mxu1 %v1120_v29  ;;  %v941_v20 = vpack.c.bf16 %v88_v16, %v89_v17  ;;  %vm1367_vm8 = vmpackc.low %vm1259_vm2, %vm997_vm7  ;;  %v87_v27 = vsel %vm85_vm6, %v82_v11, %v83_v24  ;;  %v1152_v38 = vld [vmem:[#allocation7 + $0x20] sm:$0xff]   ;;  %v1155_v41 = vld [vmem:[#allocation7 + $0x18] sm:$0xff]  }
  0x3d   :  { %429 = vmatprep.subr.bf16.mxu0 %v1087_v21  ;;  %v1156_v42 = vld [vmem:[#allocation7 + $0x50] sm:$0xff]   ;;  %v1160_v46 = vld [vmem:[#allocation7 + $0x88] sm:$0xff]   ;;  %v1162_v48 = vld [vmem:[#allocation7 + $0x40] sm:$0xff]  }
  0x3e   :  { %v1157_v43 = vld [vmem:[#allocation7 + $0x90] sm:$0xff]   ;;  %v1161_v47 = vld [vmem:[#allocation7 + $0x8] sm:$0xff]  }
  0x3f   :  { %481 = vmatpush1.bf16.msra.mxu1 %v1122_v34  ;;  %v1148_v34 = vld [vmem:[#allocation7 + $0xa8] sm:$0xff]  }
  0x40   :  { %430 = vmatpush1.bf16.msra.mxu0 %v1089_v25  ;;  %482 = vmatprep.subr.bf16.mxu1 %v1126_v35  ;;  %v71_v25 = vand.u32 15, %v67_v18  ;;  %v1149_v35 = vld [vmem:[#allocation7 + $0x28] sm:$0xff]  }
  0x41   :  { %431 = vmatprep.subr.bf16.mxu0 %v1093_v26  ;;  %v86_v26 = vsel %vm85_vm6, %v83_v24, %v84_v12 }
  0x42   :  { %vm998_vm9 = vcmp.ne.s32.totalorder %v71_v25, 0  ;;  %v945_v28 = vpack.c.bf16 %v86_v26, %v87_v27 }
  0x43   :  { %483 = vmatpush1.bf16.msra.mxu1 %v1128_v45  ;;  %vm1381_vm10 = vmpackc.low %vm1259_vm2, %vm998_vm9  ;;  %v1159_v45 = vld [vmem:[#allocation7 + $0x48] sm:$0xff]  }
  0x44   :  { %432 = vmatpush1.bf16.msra.mxu0 %v1095_v30  ;;  %484 = vmatprep.subr.bf16.mxu1 %v1132_v50  ;;  %v1144_v30 = vld [vmem:[#allocation7 + $0x70] sm:$0xff]   ;;  %v1164_v50 = vld [vmem:[#allocation7] sm:$0xff]  }
  0x45   :  { %433 = vmatprep.subr.bf16.mxu0 %v1099_v31  ;;  %v1145_v31 = vld [vmem:[#allocation7 + $0xb0] sm:$0xff]  }
  0x47   :  { %485 = vmatpush1.bf16.msra.mxu1 %v1134_v51 }
  0x48   :  { %434 = vmatpush2.bf16.msra.mxu0 %v1101_v37  ;;  %1001 = vmatprep.subr.bf16.mxu1 %v1141_v59  ;;  %v1151_v37 = vld [vmem:[#allocation7 + $0xa0] sm:$0xff]  }
  0x49   :  { %435 = vmatprep.subr.bf16.mxu0 %v1105_v40  ;;  %v1154_v40 = vld [vmem:[#allocation7 + $0x98] sm:$0xff]   ;;  %v955_v59 = vld [vmem:[%s1426_s3] ss:$0 sm:$0xff] }
  0x4a   :  { %950 = vmatmul.mubr.msk.bf16.vlgmr.msra.gmra.mxu1 %vm1325_vm3, %v949_v62 }
  0x4b   :  { %512 = vmatprep.mubr.bf16.mxu1 %v1258_v0  ;;  %1002 = vmatpush3.bf16.msra.mxu1 %v1143_v61  ;;  %v1137_v0 = vld [vmem:[#allocation5 + $0x90] ss:$8 sps:$4 sm:$0xff]  }
  0x4c   :  { %436 = vmatpush2.bf16.msra.mxu0 %v1107_v44  ;;  %1003 = vmatprep.subr.bf16.mxu1 %v1144_v30  ;;  %v1158_v44 = vld [vmem:[#allocation7 + $0x10] sm:$0xff]  }
  0x4d   :  { %437 = vmatprep.subr.bf16.mxu0 %v1111_v49  ;;  %v1163_v49 = vld [vmem:[#allocation7 + $0x80] sm:$0xff]  }
  0x4f   :  { %1004 = vmatpush3.bf16.msra.mxu1 %v1146_v32 }
  0x50   :  { %438 = vmatpush2.bf16.msra.mxu0 %v1113_v55  ;;  %1005 = vmatprep.subr.bf16.mxu1 %v1147_v33 }
  0x51   :  { %439 = vmatprep.subr.bf16.mxu0 %v1117_v60 }
  0x52   :  { %954 = vmatmul.mubr.msk.bf16.gmra.mxu1 %vm1343_vm5, %v953_v7 }
  0x53   :  { %1006 = vmatpush3.bf16.msra.mxu1 %v1149_v35 }
  0x54   :  { %440 = vmatpush2.bf16.msra.mxu0 %v1119_v63  ;;  %1007 = vmatprep.subr.bf16.mxu1 %v1150_v36 }
  0x55   :  { %441 = vmatprep.subr.bf16.mxu0 %v1123_v2 }
  0x57   :  { %1008 = vmatpush3.bf16.msra.mxu1 %v1152_v38 }
  0x58   :  { %442 = vmatpush2.bf16.msra.mxu0 %v1125_v3  ;;  %1009 = vmatprep.subr.bf16.mxu1 %v1153_v39 }
  0x59   :  { %443 = vmatprep.subr.bf16.mxu0 %v1129_v6 }
  0x5b   :  { %1010 = vmatpush3.bf16.msra.mxu1 %v1155_v41 }
  0x5c   :  { %444 = vmatpush2.bf16.msra.mxu0 %v1131_v8  ;;  %1011 = vmatprep.subr.bf16.mxu1 %v1156_v42 }
  0x5d   :  { %445 = vmatprep.subr.bf16.mxu0 %v1135_v9 }
  0x5f   :  { %1012 = vmatpush3.bf16.msra.mxu1 %v1158_v44 }
  0x60   :  { %446 = vmatpush2.bf16.msra.mxu0 %v1137_v0  ;;  %1013 = vmatprep.subr.bf16.mxu1 %v1159_v45 }
  0x61   :  { %447 = vmatprep.subr.bf16.mxu0 %v1138_v13 }
  0x63   :  { %1014 = vmatpush3.bf16.msra.mxu1 %v1161_v47 }
  0x64   :  { %448 = vmatpush2.bf16.msra.mxu0 %v1140_v15  ;;  %1015 = vmatprep.subr.bf16.mxu1 %v1162_v48 }
  0x65   :  { %1039 = vmatprep.subr.bf16.mxu0 %v1142_v19 }
  0x67   :  { %942 = vmatmul.mubr.msk.bf16.vlgmr.msra.gmra.mxu0 %vm1367_vm8, %v941_v20  ;;  %1016 = vmatpush3.bf16.msra.mxu1 %v1164_v50  ;;  %v996_v50 = vld [vmem:[%s1426_s3 + $0x1] ss:$0 sm:$0xff]  ;;  %s1260_s3 = smov [#allocation8]  }
  0x68   :  { %459 = vmatprep.mubr.bf16.mxu0 %v127_v23  ;;  %1040 = vmatpush3.bf16.msra.mxu0 %v1142_v19  ;;  %s878_s9 = sshll.u32 %s1260_s3, 4  ;;  %s879_s9 = int_to_ptr.vmem [resolvable:$true] %s878_s9 }
  0x69   :  { %1041 = vmatprep.subr.bf16.mxu0 %v1145_v31  ;;  %s1225_s10 = scalar_lea.vmem %s879_s9, 512  ;;  %p1230_p2 = scmp.lt.s32.totalorder %s879_s9, %s879_s9 }
  0x6a   :  { %p1226_p1 = scmp.ne.s32.totalorder %s879_s9, %s1225_s10  ;;  %p1231_p3 = scmp.lt.s32.totalorder %s1225_s10, %s1225_s10 }
  0x6c   :  { %1042 = vmatpush3.bf16.msra.mxu0 %v1145_v31  ;;  %p1232_p4 = por %p1231_p3, %p1230_p2 }
  0x6d   :  { %1043 = vmatprep.subr.bf16.mxu0 %v1148_v34 }
  0x6e   :  { %p1233_p5 = pnand %p1232_p4, %p1226_p1 }
  0x6f   :  { %946 = vmatmul.mubr.msk.bf16.gmra.mxu0 %vm1381_vm10, %v945_v28 }
  0x70   :  { %1044 = vmatpush3.bf16.msra.mxu0 %v1148_v34 }
  0x71   :  { %1045 = vmatprep.subr.bf16.mxu0 %v1151_v37 }
  0x74   :  { %1046 = vmatpush3.bf16.msra.mxu0 %v1151_v37 }
  0x75   :  { %1047 = vmatprep.subr.bf16.mxu0 %v1154_v40 }
  0x78   :  { %1048 = vmatpush3.bf16.msra.mxu0 %v1154_v40 }
  0x79   :  { %1049 = vmatprep.subr.bf16.mxu0 %v1157_v43 }
  0x7c   :  { %1050 = vmatpush3.bf16.msra.mxu0 %v1157_v43 }
  0x7d   :  { %1051 = vmatprep.subr.bf16.mxu0 %v1160_v46 }
  0x80   :  { %1052 = vmatpush3.bf16.msra.mxu0 %v1160_v46 }
  0x81   :  { %1053 = vmatprep.subr.bf16.mxu0 %v1163_v49 }
  0x84   :  { %1054 = vmatpush3.bf16.msra.mxu0 %v1163_v49 }
 0x10a   :  { %v504_v51 = vpop.f32.mrf.mxu1 }
 0x10c   :  { %v506_v53 = vpop.f32.mrf.mxu1 }
 0x10e   :  { %v508_v54 = vpop.f32.mrf.mxu1 }
 0x110   :  { %v510_v56 = vpop.f32.mrf.mxu1 }
 0x112   :  { %v514_v61 = vpop.f32.mrf.mxu1 }
 0x114   :  { %v516_v6 = vpop.f32.mrf.mxu1 }
 0x116   :  { %v518_v13 = vpop.f32.mrf.mxu1 }
 0x118   :  { %v520_v43 = vpop.f32.mrf.mxu1 }
 0x127   :  { %v451_v55 = vpop.f32.mrf.mxu0 }
 0x128   :  { %v505_v57 = vadd.f32 %v504_v51, %v451_v55 }
 0x129   :  { %v453_v58 = vpop.f32.mrf.mxu0 }
 0x12a   :  { %v507_v60 = vadd.f32 %v506_v53, %v453_v58  ;;  %v528_v2 = vadd.f32 %v955_v59, %v505_v57 }
 0x12b   :  { %v455_v62 = vpop.f32.mrf.mxu0 }
 0x12c   :  { %v509_v63 = vadd.f32 %v508_v54, %v455_v62  ;;  %v532_v0 = vmax.f32 %v528_v2, 0.0 }
 0x12d   :  { %v457_v3 = vpop.f32.mrf.mxu0 }
 0x12e   :  { %v529_v4 = vadd.f32 %v955_v59, %v509_v63  ;;  %v511_v5 = vadd.f32 %v510_v56, %v457_v3  ;;  %v548_v19 = vrot.slane %v532_v0, 1  ;;  %v536_v30 = vrot.slane %v532_v0, 7 }
 0x12f   :  { %v461_v7 = vpop.f32.mrf.mxu0 }
 0x130   :  { %v533_v8 = vmax.f32 %v529_v4, 0.0  ;;  %v515_v9 = vadd.f32 %v514_v61, %v461_v7 }
 0x131   :  { %v463_v10 = vpop.f32.mrf.mxu0 }
 0x132   :  { %v530_v11 = vadd.f32 %v955_v59, %v515_v9  ;;  %v517_v12 = vadd.f32 %v516_v6, %v463_v10  ;;  %v561_v15 = vpack.c.bf16 %v533_v8, %v532_v0  ;;  %v549_v16 = vrot.slane %v533_v8, 1 }
 0x133   :  { %v465_v14 = vpop.f32.mrf.mxu0  ;;  %v537_v24 = vrot.slane %v533_v8, 7 }
 0x134   :  { %v534_v17 = vmax.f32 %v530_v11, 0.0  ;;  %v519_v18 = vadd.f32 %v518_v13, %v465_v14  ;;  %790 = vmatprep.mubr.bf16.mxu1 %v561_v15  ;;  %v554_v27 = vsel %vm106_vm1, %v548_v19, %v549_v16 }
 0x135   :  { %v542_v33 = vsel %vm85_vm6, %v536_v30, %v537_v24  ;;  %v467_v44 = vpop.f32.mrf.mxu0 }
 0x136   :  { %v550_v20 = vrot.slane %v534_v17, 1  ;;  %v531_v23 = vadd.f32 %v955_v59, %v519_v18  ;;  %v538_v52 = vrot.slane %v534_v17, 7  ;;  %v521_v4 = vadd.f32 %v520_v43, %v467_v44 }
 0x138   :  { %v535_v25 = vmax.f32 %v531_v23, 0.0  ;;  %v553_v26 = vsel %vm106_vm1, %v549_v16, %v550_v20  ;;  %v541_v41 = vsel %vm85_vm6, %v537_v24, %v538_v52 }
 0x139   :  { %v990_v28 = vpack.c.bf16 %v553_v26, %v554_v27 }
 0x13a   :  { %v539_v31 = vrot.slane %v535_v25, 7  ;;  %v551_v32 = vrot.slane %v535_v25, 1  ;;  %v564_v39 = vpack.c.bf16 %v535_v25, %v534_v17 }
 0x13b   :  { %1055 = vmatprep.mubr.msk.bf16.mxu0 %vm1325_vm3, %v990_v28 }
 0x13c   :  { %v543_v34 = vsel %vm85_vm6, %v539_v31, %v536_v30  ;;  %v552_v35 = vsel %vm106_vm1, %v550_v20, %v551_v32  ;;  %v555_v36 = vsel %vm106_vm1, %v551_v32, %v548_v19  ;;  %v540_v40 = vsel %vm85_vm6, %v538_v52, %v539_v31 }
 0x13d   :  { %v982_v37 = vpack.c.bf16 %v542_v33, %v543_v34  ;;  %v994_v38 = vpack.c.bf16 %v555_v36, %v552_v35  ;;  %v986_v42 = vpack.c.bf16 %v540_v40, %v541_v41 }
 0x13f   :  { %983 = vmatmul.mubr.msk.bf16.vlgmr.msra.gmra.mxu1 %vm1367_vm8, %v982_v37  ;;  %1056 = vmatmul.mubr.msk.bf16.vlgmr.msra.gmra.mxu0 %vm1343_vm5, %v994_v38 }
 0x140   :  { %798 = vmatprep.mubr.bf16.mxu1 %v564_v39 }
 0x147   :  { %987 = vmatmul.mubr.msk.bf16.gmra.mxu1 %vm1381_vm10, %v986_v42 }
 0x1ff   :  { %v1017_v45 = vpop.f32.mrf.mxu1  ;;  %v1057_v21 = vpop.f32.mrf.mxu0 }
 0x201   :  { %v1018_v46 = vpop.f32.mrf.mxu1  ;;  %v841_v47 = vpop.f32.mrf.mxu0 }
 0x202   :  { %v1019_v1 = vadd.f32 %v1018_v46, %v1017_v45 }
 0x203   :  { %v1020_v48 = vpop.f32.mrf.mxu1  ;;  %v1058_v51 = vpop.f32.mrf.mxu0 }
 0x204   :  { %v793_v49 = vadd.f32 %v1019_v1, %v507_v60 }
 0x205   :  { %v1021_v22 = vpop.f32.mrf.mxu1  ;;  %v844_v57 = vpop.f32.mrf.mxu0 }
 0x206   :  { %v842_v53 = vadd.f32 %v841_v47, %v793_v49  ;;  %v1022_v54 = vadd.f32 %v1021_v22, %v1020_v48 }
 0x207   :  { %v1023_v55 = vpop.f32.mrf.mxu1 }
 0x208   :  { %v861_v29 = vadd.f32 %v996_v50, %v842_v53  ;;  %v796_v56 = vadd.f32 %v1022_v54, %v511_v5 }
 0x209   :  { %v1024_v58 = vpop.f32.mrf.mxu1 }
 0x20a   :  { %v865_v59 = vmax.f32 %v861_v29, 0.0  ;;  %v845_v61 = vadd.f32 %v844_v57, %v796_v56  ;;  %v1025_v62 = vadd.f32 %v1024_v58, %v1023_v55 }
 0x20b   :  { %v1026_v63 = vpop.f32.mrf.mxu1 }
 0x20c   :  { %869 = vst [vmem:[#allocation8] sm:$0xff] %v865_v59  ;;  %v862_v2 = vadd.f32 %v996_v50, %v845_v61  ;;  %v801_v60 = vadd.f32 %v1025_v62, %v517_v12 }
 0x20d   :  { %v1027_v3 = vpop.f32.mrf.mxu1 }
 0x20e   :  { %v866_v6 = vmax.f32 %v862_v2, 0.0  ;;  %v850_v7 = vadd.f32 %v1057_v21, %v801_v60  ;;  %v1028_v8 = vadd.f32 %v1027_v3, %v1026_v63 }
 0x210   :  { %870 = vst [vmem:[#allocation8 + $0x8] sm:$0xff] %v866_v6  ;;  %v863_v9 = vadd.f32 %v996_v50, %v850_v7  ;;  %v804_v0 = vadd.f32 %v1028_v8, %v521_v4 }
 0x212   :  { %v867_v10 = vmax.f32 %v863_v9, 0.0  ;;  %v853_v11 = vadd.f32 %v1058_v51, %v804_v0 }
 0x214   :  { %871 = vst [vmem:[#allocation8 + $0x10] sm:$0xff] %v867_v10  ;;  %v864_v5 = vadd.f32 %v996_v50, %v853_v11 }
 0x216   :  { %v868_v13 = vmax.f32 %v864_v5, 0.0 }
 0x218   :  { %872 = vst [vmem:[#allocation8 + $0x18] sm:$0xff] %v868_v13 }
 0x219   :  { %1236 = shalt.err (!%p1233_p5)
}
 0x21a   :  { %884 = dma.vmem_to_hbm [thread:$0]  %s879_s9, 512, %s1427_s4, [#allocation4], %s1253_s20, %s1253_s20, %s1254_s21  }
 0x21b   :  { %1249 = dma.done.wait [#allocation4], 512  }
 0x21c   :  { %1250 = vsyncadd [#allocation4], 4294966784 }
 0x21d   :  { %888 = vsyncpa [#allocation3], 1 }
 0x21e   :  { %889 = vsyncpa [#allocation6], 1 }
 0x21f   :  { %890 = vsyncpa [#allocation4], 1 }

</bundles_post_ra>
